<compile_context>
chip_gen: v5e
topology: v5e:2x2
jax: 0.10.0
libtpu: 0.0.40
codegen_flags: <defaults>
</compile_context>

<pallas_src>
import numpy as np
import jax
import jax.numpy as jnp
from jax.experimental import pallas as pl
from jax.experimental.pallas import tpu as pltpu

EPS = 1e-5  # nn.BatchNorm2d default


def _vmem_limit_bytes():
    """Generation-aware scoped-VMEM limit (~96 MiB on 128 MiB parts, <=48 MiB on v7x)."""
    cap = 64 << 20
    try:
        info = pltpu.get_tpu_info()
        cap = int(getattr(info, "vmem_capacity_bytes", cap) or cap)
    except Exception:
        pass
    return int(max(32 << 20, min(cap - (16 << 20), 96 << 20)))


def _tap_mask(H, W):
    """(9, H*W) f32: mask[k, h*W+w] = 1 iff tap k=(dy,dx) samples inside the image."""
    hh = np.arange(H)[:, None]
    ww = np.arange(W)[None, :]
    rows = []
    for dy in range(3):
        for dx in range(3):
            m = ((hh + dy - 1 >= 0) & (hh + dy - 1 < H) &
                 (ww + dx - 1 >= 0) & (ww + dx - 1 < W))
            rows.append(m.astype(np.float32).reshape(-1))
    return jnp.asarray(np.stack(rows, axis=0))


# --------------------------------------------------------------------------------------
# Fused conv stage: conv3x3 'same' (single K=9*C_in matmul) + bias/shift-plane + ReLU
#                   + per-image BN partial statistics (sum, sum of squares)
# --------------------------------------------------------------------------------------
def _make_conv_kernel(C_in, C_out, H, W):
    HW = H * W
    # Flat-spatial shift for tap k=(dy,dx): sampled element is x[:, p + (dy-1)*W + (dx-1)].
    shifts = [(-((dy - 1) * W + (dx - 1))) % HW for dy in range(3) for dx in range(3)]

    def kernel(x_ref, w_ref, mask_ref, plane_ref, out_ref, st_ref, taps_ref):
        x = x_ref[0]                                         # (C_in, HW), lane-dense
        # Build the (9*C_in, HW) tap stack once: lane roll (XLU) + border mask (VPU).
        for k, s in enumerate(shifts):
            shifted = x if s == 0 else pltpu.roll(x, shift=s, axis=1)
            taps_ref[k * C_in:(k + 1) * C_in, :] = shifted * mask_ref[k:k + 1, :]
        # Single MXU matmul with K = 9*C_in; lane-dense (C_out, HW) result.
        h = jnp.dot(w_ref[...], taps_ref[...], preferred_element_type=jnp.float32)
        # plane = bias (+ folded BN1 shift term for stage 2), then ReLU.
        h = jnp.maximum(h + plane_ref[...], 0.0)
        out_ref[0] = h
        # Per-image BN partial statistics (single-pass sum / sum of squares).
        st_ref[0, :, 0:1] = jnp.sum(h, axis=1, keepdims=True)
        st_ref[0, :, 1:2] = jnp.sum(h * h, axis=1, keepdims=True)

    return kernel


def _conv_stage(x_flat, w_mat, mask, plane, H, W):
    """One fused conv+bias+ReLU+stats stage, gridded over the batch."""
    N, C_in, HW = x_flat.shape
    C_out, K = w_mat.shape

    flops = 2 * N * C_out * K * HW
    bytes_accessed = 4 * (x_flat.size + N * C_out * HW + w_mat.size
                          + mask.size + plane.size + N * C_out * 2)

    return pl.pallas_call(
        _make_conv_kernel(C_in, C_out, H, W),
        grid=(N,),
        out_shape=(jax.ShapeDtypeStruct((N, C_out, HW), jnp.float32),
                   jax.ShapeDtypeStruct((N, C_out, 2), jnp.float32)),
        in_specs=[
            pl.BlockSpec((1, C_in, HW), lambda n: (n, 0, 0)),
            pl.BlockSpec((C_out, K), lambda n: (0, 0)),      # constant maps: fetched once
            pl.BlockSpec((9, HW), lambda n: (0, 0)),
            pl.BlockSpec((C_out, HW), lambda n: (0, 0)),
        ],
        out_specs=(
            pl.BlockSpec((1, C_out, HW), lambda n: (n, 0, 0)),
            pl.BlockSpec((1, C_out, 2), lambda n: (n, 0, 0)),
        ),
        scratch_shapes=[pltpu.VMEM((K, HW), jnp.float32)],   # tap stack
        compiler_params=pltpu.CompilerParams(
            dimension_semantics=("parallel",),
            vmem_limit_bytes=_vmem_limit_bytes()),
        cost_estimate=pl.CostEstimate(flops=flops, transcendentals=0,
                                      bytes_accessed=bytes_accessed),
    )(x_flat, w_mat, mask, plane)


def _fold_bn(stats, count, gamma, beta):
    """Reduce per-image (sum, sumsq) to a folded BN affine (tiny C-length vectors)."""
    # TODO(synk): E[x^2]-E[x]^2 in f32 can cancel for very large N*H*W; switch to a
    #             shifted / two-pass accumulation before scaling up.
    s = jnp.sum(stats[:, :, 0], axis=0)
    sq = jnp.sum(stats[:, :, 1], axis=0)
    mean = s / count
    var = jnp.maximum(sq / count - mean * mean, 0.0)         # biased (training-mode) var
    scale = gamma * jax.lax.rsqrt(var + EPS)
    shift = beta - mean * scale
    return scale, shift


# --------------------------------------------------------------------------------------
# Final stage: out = scale2 * h2 + shift2 + x   (lane-dense elementwise kernel)
# --------------------------------------------------------------------------------------
def _affine_residual_kernel(h_ref, x_ref, sc_ref, sh_ref, o_ref):
    o_ref[...] = h_ref[...] * sc_ref[...] + sh_ref[...] + x_ref[...]


def _row_tile(R):
    if R <= 2048:
        return R
    for cand in (2048, 1024, 512, 256, 128, 64, 32, 16, 8):
        if R % cand == 0:
            return cand
    return R


def _affine_residual(h, x, scale, shift):
    N, C, HW = h.shape
    R = N * C
    h2 = h.reshape(R, HW)
    x2 = x.reshape(R, HW)
    sc = jnp.tile(scale, N).reshape(R, 1)
    sh = jnp.tile(shift, N).reshape(R, 1)
    tr = _row_tile(R)

    out = pl.pallas_call(
        _affine_residual_kernel,
        grid=(R // tr,),
        out_shape=jax.ShapeDtypeStruct((R, HW), jnp.float32),
        in_specs=[
            pl.BlockSpec((tr, HW), lambda i: (i, 0)),
            pl.BlockSpec((tr, HW), lambda i: (i, 0)),
            pl.BlockSpec((tr, 1), lambda i: (i, 0)),
            pl.BlockSpec((tr, 1), lambda i: (i, 0)),
        ],
        out_specs=pl.BlockSpec((tr, HW), lambda i: (i, 0)),
        compiler_params=pltpu.CompilerParams(
            dimension_semantics=("parallel",),
            vmem_limit_bytes=_vmem_limit_bytes()),
    )(h2, x2, sc, sh)
    return out.reshape(N, C, HW)


# --------------------------------------------------------------------------------------
# ConvBlockDouble forward
# --------------------------------------------------------------------------------------
def conv_block_double(x_nchw, params):
    """params: [(w1, b1, gamma1, beta1), (w2, b2, gamma2, beta2)] in PyTorch layouts."""
    N, C, H, W = x_nchw.shape
    HW = H * W
    # Lane-dense (C, H*W) per image; plain reshape — no padded copy of the input in HBM.
    x_flat = x_nchw.reshape(N, C, HW).astype(jnp.float32)

    (w1, b1, g1, be1), (w2, b2, g2, be2) = params
    mask = _tap_mask(H, W)                                            # (9, HW), constant
    # (Cout, Cin, 3, 3) -> (Cout, 9*Cin) with column index k*Cin + ci, k = dy*3 + dx.
    w1_mat = jnp.transpose(w1, (0, 2, 3, 1)).reshape(C, 9 * C).astype(jnp.float32)
    w2_okc = jnp.transpose(w2, (0, 2, 3, 1)).reshape(C, 9, C).astype(jnp.float32)
    w2_mat = w2_okc.reshape(C, 9 * C)
    count = float(N * HW)

    # Stage 1: conv1 + b1 + ReLU + BN1 partial stats.
    plane1 = jnp.broadcast_to(b1.astype(jnp.float32)[:, None], (C, HW))
    h1, st1 = _conv_stage(x_flat, w1_mat, mask, plane1, H, W)
    scale1, shift1 = _fold_bn(st1, count, g1, be1)

    # Host-fold BN1: scale1 into conv2's Cin columns (exact) and shift1 into a
    # per-position plane that accounts for the 'same' zero-padding border (exact).
    # Tiny XLA glue on C-length vectors / a (C, HW) plane.
    w2_fold = w2_mat * jnp.tile(scale1, 9)[None, :]
    shift_plane = jnp.einsum('okc,c,kp->op', w2_okc, shift1, mask)
    plane2 = b2.astype(jnp.float32)[:, None] + shift_plane

    # Stage 2: BN1-folded conv2 + b2 + ReLU + BN2 partial stats.
    h2, st2 = _conv_stage(h1, w2_fold, mask, plane2, H, W)
    scale2, shift2 = _fold_bn(st2, count, g2, be2)

    # BN2 affine + residual add (lane-dense rows).
    out_flat = _affine_residual(h2, x_flat, scale2, shift2)
    return out_flat.reshape(N, C, H, W)


# ---------------- pure-JAX reference (for correctness check) ----------------
def _ref_single(x_nhwc, w_torch, b, g, be):
    w_hwio = jnp.transpose(w_torch, (2, 3, 1, 0))
    y = jax.lax.conv_general_dilated(
        x_nhwc, w_hwio, (1, 1), 'SAME',
        dimension_numbers=('NHWC', 'HWIO', 'NHWC')) + b.reshape(1, 1, 1, -1)
    y = jnp.maximum(y, 0.0)
    mean = y.mean(axis=(0, 1, 2), keepdims=True)
    var = ((y - mean) ** 2).mean(axis=(0, 1, 2), keepdims=True)
    return ((y - mean) * jax.lax.rsqrt(var + EPS) * g.reshape(1, 1, 1, -1)
            + be.reshape(1, 1, 1, -1))


def _ref_double(x_nchw, params):
    x = jnp.transpose(x_nchw, (0, 2, 3, 1)).astype(jnp.float32)
    h = _ref_single(x, *params[0])
    h = _ref_single(h, *params[1])
    h = h + x
    return jnp.transpose(h, (0, 3, 1, 2))


def init_params(key, num_features):
    C = num_features
    keys = jax.random.split(key, 8)
    params = []
    for i in range(2):
        w = 0.1 * jax.random.normal(keys[4 * i + 0], (C, C, 3, 3), jnp.float32)  # (Cout,Cin,kh,kw)
        b = 0.1 * jax.random.normal(keys[4 * i + 1], (C,), jnp.float32)
        g = 1.0 + 0.1 * jax.random.normal(keys[4 * i + 2], (C,), jnp.float32)    # BN weight
        be = 0.1 * jax.random.normal(keys[4 * i + 3], (C,), jnp.float32)         # BN bias
        params.append((w, b, g, be))
    return params


if __name__ == "__main__":
    key = jax.random.PRNGKey(0)
    kx, kp = jax.random.split(key)

    N, C, H, W = 2, 4, 16, 16  # num_features = 4
    x = jax.random.normal(kx, (N, C, H, W), jnp.float32)
    params = init_params(kp, C)

    fwd = jax.jit(conv_block_double)
    out = jax.block_until_ready(fwd(x, params))
    ref = jax.block_until_ready(_ref_double(x, params))

    assert out.shape == (N, C, H, W)
    np.testing.assert_allclose(np.asarray(out), np.asarray(ref), rtol=1e-4, atol=1e-4)
    print("KERNEL_OK")
</pallas_src>

<mosaic_0001>
module attributes {stable_mosaic.version = 11 : i64} {
  func.func @kernel(%arg0: i32, %arg1: memref<1x4x256xf32, #tpu.memory_space<vmem>>, %arg2: memref<4x36xf32, #tpu.memory_space<vmem>>, %arg3: memref<9x256xf32, #tpu.memory_space<vmem>>, %arg4: memref<4x256xf32, #tpu.memory_space<vmem>>, %arg5: memref<1x4x256xf32, #tpu.memory_space<vmem>>, %arg6: memref<1x4x2xf32, #tpu.memory_space<vmem>>, %arg7: memref<36x256xf32, #tpu.memory_space<vmem>>) attributes {dimension_semantics = [#tpu.dimension_semantics<parallel>], iteration_bounds = array<i64: 2>, scalar_prefetch = 0 : i64, scratch_operands = 1 : i64, tpu.core_type = #tpu.core_type<tc>, window_params = [{transform_indices = @transform_0, window_bounds = array<i64: 1, 4, 256>}, {pipeline_mode = #tpu.pipeline_mode<synchronous>, transform_indices = @transform_1, window_bounds = array<i64: 4, 36>}, {pipeline_mode = #tpu.pipeline_mode<synchronous>, transform_indices = @transform_2, window_bounds = array<i64: 9, 256>}, {pipeline_mode = #tpu.pipeline_mode<synchronous>, transform_indices = @transform_3, window_bounds = array<i64: 4, 256>}, {transform_indices = @transform_4, window_bounds = array<i64: 1, 4, 256>}, {transform_indices = @transform_5, window_bounds = array<i64: 1, 4, 2>}]} {
    %c0 = arith.constant 0 : index
    %c0_0 = arith.constant 0 : index
    %c0_1 = arith.constant 0 : index
    %0 = vector.load %arg1[%c0, %c0_0, %c0_1] : memref<1x4x256xf32, #tpu.memory_space<vmem>>, vector<1x4x256xf32>
    %1 = vector.shape_cast %0 : vector<1x4x256xf32> to vector<4x256xf32>
    %c17_i32 = arith.constant 17 : i32
    %2 = tpu.dynamic_rotate %1 by %c17_i32 dim 1 : vector<4x256xf32>, i32 -> vector<4x256xf32>
    %c0_2 = arith.constant 0 : index
    %c0_3 = arith.constant 0 : index
    %3 = vector.load %arg3[%c0_2, %c0_3] : memref<9x256xf32, #tpu.memory_space<vmem>>, vector<1x256xf32>
    %4 = vector.broadcast %3 : vector<1x256xf32> to vector<4x256xf32>
    %5 = arith.mulf %2, %4 : vector<4x256xf32>
    %c0_4 = arith.constant 0 : index
    %c0_5 = arith.constant 0 : index
    %6 = vector.load %arg7[%c0_4, %c0_5] : memref<36x256xf32, #tpu.memory_space<vmem>>, vector<4x256xf32>
    tpu.vector_store %arg7[%c0_4, %c0_5], %5 {strides = array<i32>} : memref<36x256xf32, #tpu.memory_space<vmem>>, vector<4x256xf32>,
    %c16_i32 = arith.constant 16 : i32
    %7 = tpu.dynamic_rotate %1 by %c16_i32 dim 1 : vector<4x256xf32>, i32 -> vector<4x256xf32>
    %c1 = arith.constant 1 : index
    %c0_6 = arith.constant 0 : index
    %8 = vector.load %arg3[%c1, %c0_6] : memref<9x256xf32, #tpu.memory_space<vmem>>, vector<1x256xf32>
    %9 = vector.broadcast %8 : vector<1x256xf32> to vector<4x256xf32>
    %10 = arith.mulf %7, %9 : vector<4x256xf32>
    %c4 = arith.constant 4 : index
    %c0_7 = arith.constant 0 : index
    %11 = vector.load %arg7[%c4, %c0_7] : memref<36x256xf32, #tpu.memory_space<vmem>>, vector<4x256xf32>
    tpu.vector_store %arg7[%c4, %c0_7], %10 {strides = array<i32>} : memref<36x256xf32, #tpu.memory_space<vmem>>, vector<4x256xf32>,
    %c15_i32 = arith.constant 15 : i32
    %12 = tpu.dynamic_rotate %1 by %c15_i32 dim 1 : vector<4x256xf32>, i32 -> vector<4x256xf32>
    %c2 = arith.constant 2 : index
    %c0_8 = arith.constant 0 : index
    %13 = vector.load %arg3[%c2, %c0_8] : memref<9x256xf32, #tpu.memory_space<vmem>>, vector<1x256xf32>
    %14 = vector.broadcast %13 : vector<1x256xf32> to vector<4x256xf32>
    %15 = arith.mulf %12, %14 : vector<4x256xf32>
    %c8 = arith.constant 8 : index
    %c0_9 = arith.constant 0 : index
    %16 = vector.load %arg7[%c8, %c0_9] : memref<36x256xf32, #tpu.memory_space<vmem>>, vector<4x256xf32>
    tpu.vector_store %arg7[%c8, %c0_9], %15 {strides = array<i32>} : memref<36x256xf32, #tpu.memory_space<vmem>>, vector<4x256xf32>,
    %c1_i32 = arith.constant 1 : i32
    %17 = tpu.dynamic_rotate %1 by %c1_i32 dim 1 : vector<4x256xf32>, i32 -> vector<4x256xf32>
    %c3 = arith.constant 3 : index
    %c0_10 = arith.constant 0 : index
    %18 = vector.load %arg3[%c3, %c0_10] : memref<9x256xf32, #tpu.memory_space<vmem>>, vector<1x256xf32>
    %19 = vector.broadcast %18 : vector<1x256xf32> to vector<4x256xf32>
    %20 = arith.mulf %17, %19 : vector<4x256xf32>
    %c12 = arith.constant 12 : index
    %c0_11 = arith.constant 0 : index
    %21 = vector.load %arg7[%c12, %c0_11] : memref<36x256xf32, #tpu.memory_space<vmem>>, vector<4x256xf32>
    tpu.vector_store %arg7[%c12, %c0_11], %20 {strides = array<i32>} : memref<36x256xf32, #tpu.memory_space<vmem>>, vector<4x256xf32>,
    %c4_12 = arith.constant 4 : index
    %c0_13 = arith.constant 0 : index
    %22 = vector.load %arg3[%c4_12, %c0_13] : memref<9x256xf32, #tpu.memory_space<vmem>>, vector<1x256xf32>
    %23 = vector.broadcast %22 : vector<1x256xf32> to vector<4x256xf32>
    %24 = arith.mulf %1, %23 : vector<4x256xf32>
    %c16 = arith.constant 16 : index
    %c0_14 = arith.constant 0 : index
    %25 = vector.load %arg7[%c16, %c0_14] : memref<36x256xf32, #tpu.memory_space<vmem>>, vector<4x256xf32>
    tpu.vector_store %arg7[%c16, %c0_14], %24 {strides = array<i32>} : memref<36x256xf32, #tpu.memory_space<vmem>>, vector<4x256xf32>,
    %c255_i32 = arith.constant 255 : i32
    %26 = tpu.dynamic_rotate %1 by %c255_i32 dim 1 : vector<4x256xf32>, i32 -> vector<4x256xf32>
    %c5 = arith.constant 5 : index
    %c0_15 = arith.constant 0 : index
    %27 = vector.load %arg3[%c5, %c0_15] : memref<9x256xf32, #tpu.memory_space<vmem>>, vector<1x256xf32>
    %28 = vector.broadcast %27 : vector<1x256xf32> to vector<4x256xf32>
    %29 = arith.mulf %26, %28 : vector<4x256xf32>
    %c20 = arith.constant 20 : index
    %c0_16 = arith.constant 0 : index
    %30 = vector.load %arg7[%c20, %c0_16] : memref<36x256xf32, #tpu.memory_space<vmem>>, vector<4x256xf32>
    tpu.vector_store %arg7[%c20, %c0_16], %29 {strides = array<i32>} : memref<36x256xf32, #tpu.memory_space<vmem>>, vector<4x256xf32>,
    %c241_i32 = arith.constant 241 : i32
    %31 = tpu.dynamic_rotate %1 by %c241_i32 dim 1 : vector<4x256xf32>, i32 -> vector<4x256xf32>
    %c6 = arith.constant 6 : index
    %c0_17 = arith.constant 0 : index
    %32 = vector.load %arg3[%c6, %c0_17] : memref<9x256xf32, #tpu.memory_space<vmem>>, vector<1x256xf32>
    %33 = vector.broadcast %32 : vector<1x256xf32> to vector<4x256xf32>
    %34 = arith.mulf %31, %33 : vector<4x256xf32>
    %c24 = arith.constant 24 : index
    %c0_18 = arith.constant 0 : index
    %35 = vector.load %arg7[%c24, %c0_18] : memref<36x256xf32, #tpu.memory_space<vmem>>, vector<4x256xf32>
    tpu.vector_store %arg7[%c24, %c0_18], %34 {strides = array<i32>} : memref<36x256xf32, #tpu.memory_space<vmem>>, vector<4x256xf32>,
    %c240_i32 = arith.constant 240 : i32
    %36 = tpu.dynamic_rotate %1 by %c240_i32 dim 1 : vector<4x256xf32>, i32 -> vector<4x256xf32>
    %c7 = arith.constant 7 : index
    %c0_19 = arith.constant 0 : index
    %37 = vector.load %arg3[%c7, %c0_19] : memref<9x256xf32, #tpu.memory_space<vmem>>, vector<1x256xf32>
    %38 = vector.broadcast %37 : vector<1x256xf32> to vector<4x256xf32>
    %39 = arith.mulf %36, %38 : vector<4x256xf32>
    %c28 = arith.constant 28 : index
    %c0_20 = arith.constant 0 : index
    %40 = vector.load %arg7[%c28, %c0_20] : memref<36x256xf32, #tpu.memory_space<vmem>>, vector<4x256xf32>
    tpu.vector_store %arg7[%c28, %c0_20], %39 {strides = array<i32>} : memref<36x256xf32, #tpu.memory_space<vmem>>, vector<4x256xf32>,
    %c239_i32 = arith.constant 239 : i32
    %41 = tpu.dynamic_rotate %1 by %c239_i32 dim 1 : vector<4x256xf32>, i32 -> vector<4x256xf32>
    %c8_21 = arith.constant 8 : index
    %c0_22 = arith.constant 0 : index
    %42 = vector.load %arg3[%c8_21, %c0_22] : memref<9x256xf32, #tpu.memory_space<vmem>>, vector<1x256xf32>
    %43 = vector.broadcast %42 : vector<1x256xf32> to vector<4x256xf32>
    %44 = arith.mulf %41, %43 : vector<4x256xf32>
    %c32 = arith.constant 32 : index
    %c0_23 = arith.constant 0 : index
    %45 = vector.load %arg7[%c32, %c0_23] : memref<36x256xf32, #tpu.memory_space<vmem>>, vector<4x256xf32>
    tpu.vector_store %arg7[%c32, %c0_23], %44 {strides = array<i32>} : memref<36x256xf32, #tpu.memory_space<vmem>>, vector<4x256xf32>,
    %c0_24 = arith.constant 0 : index
    %c0_25 = arith.constant 0 : index
    %46 = vector.load %arg2[%c0_24, %c0_25] : memref<4x36xf32, #tpu.memory_space<vmem>>, vector<4x36xf32>
    %c0_26 = arith.constant 0 : index
    %c0_27 = arith.constant 0 : index
    %47 = vector.load %arg7[%c0_26, %c0_27] : memref<36x256xf32, #tpu.memory_space<vmem>>, vector<36x256xf32>
    %cst = arith.constant dense<0.000000e+00> : vector<4x256xf32>
    %48 = tpu.matmul %46, %47, %cst {dimension_numbers = #tpu.dot_dimension_numbers<[1], [0], [0], [1], [0, 0, 1, 1], [], []>} : vector<4x36xf32>, vector<36x256xf32>, vector<4x256xf32> -> vector<4x256xf32>
    %c0_28 = arith.constant 0 : index
    %c0_29 = arith.constant 0 : index
    %49 = vector.load %arg4[%c0_28, %c0_29] : memref<4x256xf32, #tpu.memory_space<vmem>>, vector<4x256xf32>
    %50 = arith.addf %48, %49 : vector<4x256xf32>
    %cst_30 = arith.constant 0.000000e+00 : f32
    %51 = vector.broadcast %cst_30 : f32 to vector<4x256xf32>
    %52 = arith.maximumf %50, %51 : vector<4x256xf32>
    %c0_31 = arith.constant 0 : index
    %c0_32 = arith.constant 0 : index
    %c0_33 = arith.constant 0 : index
    %53 = vector.load %arg5[%c0_31, %c0_32, %c0_33] : memref<1x4x256xf32, #tpu.memory_space<vmem>>, vector<1x4x256xf32>
    %54 = vector.shape_cast %53 : vector<1x4x256xf32> to vector<4x256xf32>
    %55 = vector.shape_cast %52 : vector<4x256xf32> to vector<1x4x256xf32>
    tpu.vector_store %arg5[%c0_31, %c0_32, %c0_33], %55 {strides = array<i32>} : memref<1x4x256xf32, #tpu.memory_space<vmem>>, vector<1x4x256xf32>,
    %cst_34 = arith.constant dense<0.000000e+00> : vector<4xf32>
    %56 = vector.multi_reduction <add>, %52, %cst_34 [1] : vector<4x256xf32> to vector<4xf32>
    %57 = vector.shape_cast %56 : vector<4xf32> to vector<4x1xf32>
    %c0_35 = arith.constant 0 : index
    %c0_36 = arith.constant 0 : index
    %c0_37 = arith.constant 0 : index
    %58 = vector.load %arg6[%c0_35, %c0_36, %c0_37] : memref<1x4x2xf32, #tpu.memory_space<vmem>>, vector<1x4x1xf32>
    %59 = vector.shape_cast %58 : vector<1x4x1xf32> to vector<4x1xf32>
    %60 = vector.shape_cast %57 : vector<4x1xf32> to vector<1x4x1xf32>
    tpu.vector_store %arg6[%c0_35, %c0_36, %c0_37], %60 {strides = array<i32>} : memref<1x4x2xf32, #tpu.memory_space<vmem>>, vector<1x4x1xf32>,
    %61 = arith.mulf %52, %52 : vector<4x256xf32>
    %cst_38 = arith.constant dense<0.000000e+00> : vector<4xf32>
    %62 = vector.multi_reduction <add>, %61, %cst_38 [1] : vector<4x256xf32> to vector<4xf32>
    %63 = vector.shape_cast %62 : vector<4xf32> to vector<4x1xf32>
    %c0_39 = arith.constant 0 : index
    %c0_40 = arith.constant 0 : index
    %c1_41 = arith.constant 1 : index
    %64 = vector.load %arg6[%c0_39, %c0_40, %c1_41] : memref<1x4x2xf32, #tpu.memory_space<vmem>>, vector<1x4x1xf32>
    %65 = vector.shape_cast %64 : vector<1x4x1xf32> to vector<4x1xf32>
    %66 = vector.shape_cast %63 : vector<4x1xf32> to vector<1x4x1xf32>
    tpu.vector_store %arg6[%c0_39, %c0_40, %c1_41], %66 {strides = array<i32>} : memref<1x4x2xf32, #tpu.memory_space<vmem>>, vector<1x4x1xf32>,
    return
  }
  func.func @transform_0(%arg0: i32) -> (i32, i32, i32) {
    %c0_i32 = arith.constant 0 : i32
    %c0_i32_0 = arith.constant 0 : i32
    %c0_i32_1 = arith.constant 0 : i32
    return %arg0, %c0_i32, %c0_i32_0 : i32, i32, i32
  }
  func.func @transform_1(%arg0: i32) -> (i32, i32) {
    %c0_i32 = arith.constant 0 : i32
    %c0_i32_0 = arith.constant 0 : i32
    %c0_i32_1 = arith.constant 0 : i32
    return %c0_i32, %c0_i32_0 : i32, i32
  }
  func.func @transform_2(%arg0: i32) -> (i32, i32) {
    %c0_i32 = arith.constant 0 : i32
    %c0_i32_0 = arith.constant 0 : i32
    %c0_i32_1 = arith.constant 0 : i32
    return %c0_i32, %c0_i32_0 : i32, i32
  }
  func.func @transform_3(%arg0: i32) -> (i32, i32) {
    %c0_i32 = arith.constant 0 : i32
    %c0_i32_0 = arith.constant 0 : i32
    %c0_i32_1 = arith.constant 0 : i32
    return %c0_i32, %c0_i32_0 : i32, i32
  }
  func.func @transform_4(%arg0: i32) -> (i32, i32, i32) {
    %c0_i32 = arith.constant 0 : i32
    %c0_i32_0 = arith.constant 0 : i32
    %c0_i32_1 = arith.constant 0 : i32
    return %arg0, %c0_i32, %c0_i32_0 : i32, i32, i32
  }
  func.func @transform_5(%arg0: i32) -> (i32, i32, i32) {
    %c0_i32 = arith.constant 0 : i32
    %c0_i32_0 = arith.constant 0 : i32
    %c0_i32_1 = arith.constant 0 : i32
    return %arg0, %c0_i32, %c0_i32_0 : i32, i32, i32
  }
}

module attributes {stable_mosaic.version = 11 : i64} {
  func.func @_affine_residual_kernel(%arg0: i32, %arg1: memref<8x256xf32, #tpu.memory_space<vmem>>, %arg2: memref<8x256xf32, #tpu.memory_space<vmem>>, %arg3: memref<8x1xf32, #tpu.memory_space<vmem>>, %arg4: memref<8x1xf32, #tpu.memory_space<vmem>>, %arg5: memref<8x256xf32, #tpu.memory_space<vmem>>) attributes {dimension_semantics = [#tpu.dimension_semantics<parallel>], iteration_bounds = array<i64: 1>, scalar_prefetch = 0 : i64, scratch_operands = 0 : i64, tpu.core_type = #tpu.core_type<tc>, window_params = [{transform_indices = @transform_0, window_bounds = array<i64: 8, 256>}, {transform_indices = @transform_1, window_bounds = array<i64: 8, 256>}, {transform_indices = @transform_2, window_bounds = array<i64: 8, 1>}, {transform_indices = @transform_3, window_bounds = array<i64: 8, 1>}, {transform_indices = @transform_4, window_bounds = array<i64: 8, 256>}]} {
    %c0 = arith.constant 0 : index
    %c0_0 = arith.constant 0 : index
    %0 = vector.load %arg1[%c0, %c0_0] : memref<8x256xf32, #tpu.memory_space<vmem>>, vector<8x256xf32>
    %c0_1 = arith.constant 0 : index
    %c0_2 = arith.constant 0 : index
    %1 = vector.load %arg3[%c0_1, %c0_2] : memref<8x1xf32, #tpu.memory_space<vmem>>, vector<8x1xf32>
    %2 = vector.broadcast %1 : vector<8x1xf32> to vector<8x256xf32>
    %3 = arith.mulf %0, %2 : vector<8x256xf32>
    %c0_3 = arith.constant 0 : index
    %c0_4 = arith.constant 0 : index
    %4 = vector.load %arg4[%c0_3, %c0_4] : memref<8x1xf32, #tpu.memory_space<vmem>>, vector<8x1xf32>
    %5 = vector.broadcast %4 : vector<8x1xf32> to vector<8x256xf32>
    %6 = arith.addf %3, %5 : vector<8x256xf32>
    %c0_5 = arith.constant 0 : index
    %c0_6 = arith.constant 0 : index
    %7 = vector.load %arg2[%c0_5, %c0_6] : memref<8x256xf32, #tpu.memory_space<vmem>>, vector<8x256xf32>
    %8 = arith.addf %6, %7 : vector<8x256xf32>
    %c0_7 = arith.constant 0 : index
    %c0_8 = arith.constant 0 : index
    %9 = vector.load %arg5[%c0_7, %c0_8] : memref<8x256xf32, #tpu.memory_space<vmem>>, vector<8x256xf32>
    tpu.vector_store %arg5[%c0_7, %c0_8], %8 {strides = array<i32>} : memref<8x256xf32, #tpu.memory_space<vmem>>, vector<8x256xf32>,
    return
  }
  func.func @transform_0(%arg0: i32) -> (i32, i32) {
    %c0_i32 = arith.constant 0 : i32
    %c0_i32_0 = arith.constant 0 : i32
    return %arg0, %c0_i32 : i32, i32
  }
  func.func @transform_1(%arg0: i32) -> (i32, i32) {
    %c0_i32 = arith.constant 0 : i32
    %c0_i32_0 = arith.constant 0 : i32
    return %arg0, %c0_i32 : i32, i32
  }
  func.func @transform_2(%arg0: i32) -> (i32, i32) {
    %c0_i32 = arith.constant 0 : i32
    %c0_i32_0 = arith.constant 0 : i32
    return %arg0, %c0_i32 : i32, i32
  }
  func.func @transform_3(%arg0: i32) -> (i32, i32) {
    %c0_i32 = arith.constant 0 : i32
    %c0_i32_0 = arith.constant 0 : i32
    return %arg0, %c0_i32 : i32, i32
  }
  func.func @transform_4(%arg0: i32) -> (i32, i32) {
    %c0_i32 = arith.constant 0 : i32
    %c0_i32_0 = arith.constant 0 : i32
    return %arg0, %c0_i32 : i32, i32
  }
}

</mosaic_0001>

<bundles_post_ra>
// kernel: tile.18
= control target key start
LH: loop header
LB: loop body
LE: loop exit
PB: predicated region body
PF: predicated region fallthrough
CT: control target
= control target key end

     0   :  { %s28_s0 = inlined_call_operand.vmem [shape: f32[4], index: 0, kind: input, shape index: {}]   ;;  %s29_s1 = inlined_call_operand.vmem [shape: f32[9,4], index: 1, kind: output, shape index: {}]  }
   0x1   :  { %v4_v0 = vld [vmem:[%s28_s0] ss:$0 sm:$0xff] }
   0x2   :  { %5 = vst [vmem:[%s29_s1] sm:$0xff] %v4_v0 }
   0x3   :  { %8 = vst [vmem:[%s29_s1 + $0x8] sm:$0xff] %v4_v0 }

// kernel: mul.14
= control target key start
LH: loop header
LB: loop body
LE: loop exit
PB: predicated region body
PF: predicated region fallthrough
CT: control target
= control target key end

     0   :  { %s75_s10 = smov 32   ;;  %s76_s11 = smov 24   ;;  %vm3_vm0 = vcmask 31744   ;;  %vm9_vm1 = vcmask 294144   ;;  %vm15_vm2 = vcmask 261344   ;;  %vm21_vm3 = vcmask 228544   ;;  %s123_s0 = inlined_call_operand.vmem [shape: f32[9,4], index: 0, kind: input, shape index: {}]   ;;  %s124_s1 = inlined_call_operand.vmem [shape: f32[36], index: 1, kind: output, shape index: {}]  }
   0x1   :  { %v59_v0 = vld [vmem:[%s123_s0 + $0x8] sm:$0x1]   ;;  %v61_v1 = vld [vmem:[%s123_s0 + $0x6] sm:$0x1]   ;;  %v63_v2 = vld [vmem:[%s123_s0 + $0x4] sm:$0x1]  }
   0x2   :  { %7 = vrot.lane.b32.xlu0 %v59_v0, %s75_s10  ;;  %19 = vrot.lane.b32.xlu1 %v61_v1, %s76_s11  ;;  %s77_s14 = smov 16   ;;  %v60_v3 = vld [vmem:[%s123_s0 + $0x7] sm:$0x1]   ;;  %v62_v4 = vld [vmem:[%s123_s0 + $0x5] sm:$0x1]   ;;  %s78_s19 = smov 28  }
   0x3   :  { %31 = vrot.lane.b32.xlu2 %v63_v2, %s77_s14  ;;  %s79_s20 = smov 20   ;;  %v64_v5 = vld [vmem:[%s123_s0 + $0x3] sm:$0x1]   ;;  %s80_s23 = smov 12   ;;  %v65_v6 = vld [vmem:[%s123_s0 + $0x2] sm:$0x1]  }
   0x4   :  { %v66_v7 = vld [vmem:[%s123_s0 + $0x1] sm:$0x1]   ;;  %s81_s28 = smov 8   ;;  %s82_s29 = smov 4   ;;  %v2_v8 = vld [vmem:[%s123_s0] sm:$0x1]  }
   0x5   :  { %4 = vst.msk [vmem:[#allocation0] sm:$0x1] %vm3_vm0, %v2_v8   ;;  %vm27_vm4 = vcmask 195744   ;;  %vm33_vm5 = vcmask 162944   ;;  %vm39_vm6 = vcmask 130144   ;;  %vm45_vm7 = vcmask 97344  }
   0x6   :  { %vm51_vm8 = vcmask 64544  }
   0xa   :  { %13 = vrot.lane.b32.xlu0 %v60_v3, %s78_s19  ;;  %25 = vrot.lane.b32.xlu1 %v62_v4, %s79_s20 }
   0xb   :  { %37 = vrot.lane.b32.xlu2 %v64_v5, %s80_s23 }
  0x12   :  { %43 = vrot.lane.b32.xlu0 %v65_v6, %s81_s28  ;;  %49 = vrot.lane.b32.xlu1 %v66_v7, %s82_s29 }
  0x5d   :  { %v32_v9 = vpop.permute.xlu2 %31  }
  0x65   :  { %v38_v10 = vpop.permute.xlu2 %37  }
  0x74   :  { %v8_v11 = vpop.permute.xlu0 %7   ;;  %v20_v12 = vpop.permute.xlu1 %19  }
  0x75   :  { %10 = vst.msk [vmem:[#allocation0] sm:$0x1] %vm9_vm1, %v8_v11  }
  0x7c   :  { %v14_v13 = vpop.permute.xlu0 %13   ;;  %v26_v14 = vpop.permute.xlu1 %25  }
  0x7d   :  { %16 = vst.msk [vmem:[#allocation0] sm:$0x1] %vm15_vm2, %v14_v13  }
  0x7e   :  { %22 = vst.msk [vmem:[#allocation0] sm:$0x1] %vm21_vm3, %v20_v12  }
  0x7f   :  { %28 = vst.msk [vmem:[#allocation0] sm:$0x1] %vm27_vm4, %v26_v14  }
  0x80   :  { %34 = vst.msk [vmem:[#allocation0] sm:$0x1] %vm33_vm5, %v32_v9  }
  0x81   :  { %40 = vst.msk [vmem:[#allocation0] sm:$0x1] %vm39_vm6, %v38_v10  }
  0x84   :  { %v44_v15 = vpop.permute.xlu0 %43   ;;  %v50_v16 = vpop.permute.xlu1 %49  }
  0x85   :  { %46 = vst.msk [vmem:[#allocation0] sm:$0x1] %vm45_vm7, %v44_v15  }
  0x86   :  { %52 = vst.msk [vmem:[#allocation0] sm:$0x1] %vm51_vm8, %v50_v16  }
  0x8d   :  { %v55_v17 = vld [vmem:[#allocation0] sm:$0x1] }
  0x8e   :  { %58 = vst [vmem:[%s124_s1] sm:$0x1] %v55_v17 }

// kernel: tile.28
= control target key start
LH: loop header
LB: loop body
LE: loop exit
PB: predicated region body
PF: predicated region fallthrough
CT: control target
= control target key end

     0   :  { %s22_s0 = inlined_call_operand.vmem [shape: f32[4], index: 0, kind: input, shape index: {}]   ;;  %s23_s1 = inlined_call_operand.vmem [shape: f32[2,4], index: 1, kind: output, shape index: {}]  }
   0x1   :  { %v4_v0 = vld [vmem:[%s22_s0] ss:$0 sm:$0xff] }
   0x2   :  { %5 = vst [vmem:[%s23_s1] sm:$0x3] %v4_v0 }

// kernel: tile.0
= control target key start
LH: loop header
LB: loop body
LE: loop exit
PB: predicated region body
PF: predicated region fallthrough
CT: control target
= control target key end

     0   :  { %s34_s8 = smov 125   ;;  %s35_s9 = smov 126   ;;  %vm7_vm0 = vcmask 7168   ;;  %s61_s0 = inlined_call_operand.vmem [shape: f32[2,4], index: 0, kind: input, shape index: {}]   ;;  %s62_s1 = inlined_call_operand.vmem [shape: f32[8,1], index: 1, kind: output, shape index: {}]  }
   0x1   :  { %v4_v0 = vld [vmem:[%s61_s0] sm:$0x3]  ;;  %s33_s0 = smov 127  }
   0x2   :  { %5 = vst [vmem:[#allocation0] sm:$0x3] %v4_v0 }
   0x9   :  { %v9_v1 = vld [vmem:[#allocation0] sm:$0x3]  }
   0xa   :  { %v21_v2 = vld [vmem:[#allocation0] sm:$0x3]   ;;  %10 = vrot.lane.b32.xlu0 %v9_v1, %s33_s0 }
   0xb   :  { %22 = vrot.lane.b32.xlu1 %v21_v2, %s34_s8  ;;  %v15_v3 = vld [vmem:[#allocation0] sm:$0x3]  }
   0xc   :  { %v6_v4 = vld [vmem:[#allocation0] sm:$0x3]  }
   0xd   :  { %8 = vst.msk [vmem:[%s62_s1] ss:$4 sm:$0x3] %vm7_vm0, %v6_v4  }
  0x12   :  { %16 = vrot.lane.b32.xlu0 %v15_v3, %s35_s9 }
  0x7c   :  { %v11_v5 = vpop.permute.xlu0 %10  }
  0x7d   :  { %v23_v6 = vpop.permute.xlu1 %22   ;;  %27 = vst.msk [vmem:[%s62_s1 + $0x1] ss:$4 sm:$0x3] %vm7_vm0, %v11_v5  }
  0x7e   :  { %29 = vst.msk [vmem:[%s62_s1 + $0x3] ss:$4 sm:$0x3] %vm7_vm0, %v23_v6  }
  0x84   :  { %v17_v7 = vpop.permute.xlu0 %16  }
  0x85   :  { %28 = vst.msk [vmem:[%s62_s1 + $0x2] ss:$4 sm:$0x3] %vm7_vm0, %v17_v7  }

// kernel: conv_block_double.5
= control target key start
LH: loop header
LB: loop body
LE: loop exit
PB: predicated region body
PF: predicated region fallthrough
CT: control target
= control target key end

     0   :  { %v47_v0 = vmov 0   ;;  %s97_s2 = inlined_call_operand.vmem [shape: f32[8,1], index: 2, kind: input, shape index: {}]   ;;  %s98_s3 = inlined_call_operand.vmem [shape: f32[8,1], index: 3, kind: input, shape index: {}]   ;;  %s99_s0 = inlined_call_operand.vmem [shape: f32[8,256], index: 0, kind: input, shape index: {}]   ;;  %s100_s1 = inlined_call_operand.vmem [shape: f32[8,256], index: 1, kind: input, shape index: {}]   ;;  %s101_s4 = inlined_call_operand.vmem [shape: f32[8,256], index: 4, kind: output, shape index: {}]  }
   0x1   :  { %46 = vset.pattern.permute.xlu0 %v47_v0  ;;  %v19_v1 = vld [vmem:[%s97_s2] sm:$0xff]  ;;  %v18_v5 = vld [vmem:[%s99_s0 + $0x8] sm:$0xff] }
   0x2   :  { %22 = vperm.xlu0 %46, %v19_v1   ;;  %v27_v2 = vld [vmem:[%s98_s3] sm:$0xff]  ;;  %v36_v10 = vld [vmem:[%s100_s1 + $0x8] sm:$0xff] }
   0x3   :  { %v17_v4 = vld [vmem:[%s99_s0] sm:$0xff] }
   0x4   :  { %v35_v9 = vld [vmem:[%s100_s1] sm:$0xff] }
   0xa   :  { %30 = vperm.xlu0 %46, %v27_v2  }
  0x74   :  { %v23_v3 = vpop.permute.xlu0 %22 }
  0x75   :  { %v25_v6 = vmul.f32 %v23_v3, %v17_v4  ;;  %v26_v7 = vmul.f32 %v23_v3, %v18_v5 }
  0x7c   :  { %v31_v8 = vpop.permute.xlu0 %30 }
  0x7d   :  { %v33_v11 = vadd.f32 %v31_v8, %v25_v6  ;;  %v34_v12 = vadd.f32 %v31_v8, %v26_v7 }
  0x7f   :  { %v37_v13 = vadd.f32 %v35_v9, %v33_v11  ;;  %v38_v14 = vadd.f32 %v36_v10, %v34_v12 }
  0x81   :  { %39 = vst [vmem:[%s101_s4] sm:$0xff] %v37_v13 }
  0x82   :  { %40 = vst [vmem:[%s101_s4 + $0x8] sm:$0xff] %v38_v14 }

// kernel: conv_block_double.3
= control target key start
LH: loop header
LB: loop body
LE: loop exit
PB: predicated region body
PF: predicated region fallthrough
CT: control target
= control target key end

     0   :  { %s731_s18 = smov 0   ;;  %s816_s0 = inlined_call_operand.vmem [shape: f32[2,4,256], index: 0, kind: input, shape index: {}]   ;;  %s817_s1 = inlined_call_operand.vmem [shape: f32[4,36], index: 1, kind: input, shape index: {}]   ;;  %s818_s2 = inlined_call_operand.vmem [shape: f32[9,256], index: 2, kind: input, shape index: {}]   ;;  %s819_s3 = inlined_call_operand.vmem [shape: f32[4,256], index: 3, kind: input, shape index: {}]   ;;  %s820_s4 = inlined_call_operand.vmem [shape: f32[2,4,256], index: 4, kind: output, shape index: {0}]   ;;  %s821_s5 = inlined_call_operand.vmem [shape: f32[2,4,2], index: 5, kind: output, shape index: {1}]  }
   0x1 LB: > { %s643_s19 = sadd.s32 4294967295, %s691_s18   ;;  %p647_p0 = scmp.ge.s32.totalorder %s691_s18, 1  ;;  %s691_s18 = sphi %s731_s18, %s16_s18  }
   0x2   : > { %p190_p1 = scmp.lt.s32.totalorder %s691_s18, 3 }
   0x4   : > { %p191_p2 = pnand %p647_p0, %p190_p1 }
   0x5   : > { %p222_p3 = scmp.lt.s32.totalorder (!%p191_p2), %s643_s19, 1  ;;  %s693_s26 = smov (!%p191_p2), 16  }
   0x6   : > { %194 = sbr.rel (%p191_p2) target bundleno = 485 (0x1e5), region = 36  ;;  %s694_s27 = smov (!%p191_p2), 15  }
   0x7   : > { %s695_s28 = smov (!%p191_p2), 1   ;;  %s696_s29 = smov (!%p191_p2), 127  }
   0x8   : > { %s697_s30 = smov (!%p191_p2), 113   ;;  %s698_s6 = smov (!%p191_p2), 112  }
   0x9   : > { %s699_s7 = smov (!%p191_p2), 17   ;;  %s700_s8 = smov (!%p191_p2), 111  }
   0xb   : > { %s823_s19 = smov (!%p222_p3, %s643_s19), 1  ;;  %v656_v3 = vld [vmem:[%s818_s2 + $0x4] ss:$8 sm:$0x3]  ;;  %vm349_vm0 = vcmask 1043456   ;;  %v247_v26 = vlaneseq  ;;  %vm483_vm9 = vcmask 293888  }
   0xc   : > { %s667_s20 = sshll.u32 %s823_s19, 3  ;;  %v347_v6 = vperm.slane %v656_v3, 1  ;;  %v346_v7 = vperm.slane %v656_v3, 0  ;;  %v653_v28 = vld [vmem:[%s818_s2 + $0x1] ss:$8 sm:$0x3] }
   0xd   : > { %s226_s23 = scalar_lea.vmem %s816_s0, %s667_s20  ;;  %v753_v27 = vand.u32 127, %v247_v26  ;;  %v277_v29 = vperm.slane %v653_v28, 0  ;;  %v278_v30 = vperm.slane %v653_v28, 1  ;;  %v655_v41 = vld [vmem:[%s818_s2 + $0x3] ss:$8 sm:$0x3]  ;;  %s231_s9 = scalar_lea.vmem %s820_s4, %s667_s20 }
   0xe   : > { %v236_v0 = vld [vmem:[%s226_s23] sm:$0xff]  ;;  %v348_v8 = vrot.slane %v347_v6, 4  ;;  %v329_v42 = vperm.slane %v655_v41, 0  ;;  %v330_v43 = vperm.slane %v655_v41, 1  ;;  %s652_s10 = sshll.u32 %s823_s19, 2  ;;  %vm546_vm10 = vcmask 3072  }
   0xf   : > { %238 = vst [vmem:[#allocation1] ss:$2 sm:$0xff] %v236_v0  ;;  %vm271_vm1 = vcmp.lt.s32.totalorder %v753_v27, 16  ;;  %vm323_vm2 = vcmp.lt.s32.totalorder %v753_v27, 1  ;;  %vm370_vm3 = vcmp.lt.s32.totalorder %v753_v27, 127  ;;  %vm399_vm4 = vcmp.lt.s32.totalorder %v753_v27, 113  ;;  %s235_s20 = scalar_lea.vmem %s821_s5, %s652_s10 }
  0x10   : > { %v350_v11 = vsel %vm349_vm0, %v346_v7, %v348_v8  ;;  %v657_v45 = vld [vmem:[%s818_s2 + $0x5] ss:$8 sm:$0x3]  ;;  %v658_v61 = vld [vmem:[%s818_s2 + $0x6] ss:$8 sm:$0x3] }
  0x11   : > { %v352_v12 = vmul.f32 %v350_v11, %v236_v0  ;;  %v376_v48 = vperm.slane %v657_v45, 0  ;;  %v377_v49 = vperm.slane %v657_v45, 1  ;;  %v405_v62 = vperm.slane %v658_v61, 0  ;;  %v659_v7 = vld [vmem:[%s818_s2 + $0x7] ss:$8 sm:$0x3] }
  0x12   : > { %v406_v63 = vperm.slane %v658_v61, 1  ;;  %vm422_vm5 = vcmp.lt.s32.totalorder %v753_v27, 112  ;;  %v428_v8 = vperm.slane %v659_v7, 0  ;;  %vm249_vm6 = vcmp.lt.s32.totalorder %v753_v27, 17 }
  0x13   : > { %vm451_vm7 = vcmp.lt.s32.totalorder %v753_v27, 111  ;;  %vm300_vm8 = vcmp.lt.s32.totalorder %v753_v27, 15  ;;  %vm555_vm11 = vcmask 11272  }
  0x16   : > { %v239_v1 = vld.sshfl [vmem:[#allocation1] sm:$0xff pattern:$0x75316420]  ;;  %v240_v2 = vld.sshfl [vmem:[#allocation1 + $0x8] sm:$0xff pattern:$0x75316420] }
  0x17   : > { %262 = vst [vmem:[#allocation1] ss:$2 sm:$0xff] %v236_v0 }
  0x1e   : > { %v263_v4 = vld.sshfl [vmem:[#allocation1] sm:$0xff pattern:$0x75316420]  ;;  %v264_v5 = vld.sshfl [vmem:[#allocation1 + $0x8] sm:$0xff pattern:$0x75316420] }
  0x1f   : > { %291 = vst [vmem:[#allocation1] ss:$2 sm:$0xff] %v236_v0  ;;  %267 = vrot.lane.b32.xlu1 %v263_v4, %s693_s26  ;;  %269 = vrot.lane.b32.xlu2 %v264_v5, %s693_s26 }
  0x26   : > { %v292_v9 = vld.sshfl [vmem:[#allocation1] sm:$0xff pattern:$0x75316420]  ;;  %v293_v10 = vld.sshfl [vmem:[#allocation1 + $0x8] sm:$0xff pattern:$0x75316420] }
  0x27   : > { %296 = vrot.lane.b32.xlu0 %v292_v9, %s694_s27  ;;  %314 = vst [vmem:[#allocation1] ss:$2 sm:$0xff] %v236_v0  ;;  %v429_v9 = vperm.slane %v659_v7, 1 }
  0x2e   : > { %v316_v13 = vld.sshfl [vmem:[#allocation1 + $0x8] sm:$0xff pattern:$0x75316420]  ;;  %v315_v14 = vld.sshfl [vmem:[#allocation1] sm:$0xff pattern:$0x75316420] }
  0x2f   : > { %321 = vrot.lane.b32.xlu0 %v316_v13, %s695_s28  ;;  %354 = vst [vmem:[#allocation1] ss:$2 sm:$0xff] %v352_v12  ;;  %319 = vrot.lane.b32.xlu2 %v315_v14, %s695_s28  ;;  %v476_v12 = vld [vmem:[%s819_s3] sm:$0xff] }
  0x36   : > { %v355_v15 = vld.sshfl [vmem:[#allocation1] sm:$0xff pattern:$0x75316420]  ;;  %v356_v16 = vld.sshfl [vmem:[#allocation1 + $0x8] sm:$0xff pattern:$0x75316420] }
  0x37   : > { %361 = vst [vmem:[#allocation1] ss:$2 sm:$0xff] %v236_v0 }
  0x38   : > { %359 = vst [vmem:[#allocation2 + $0x48] sm:$0xf] %v355_v15 }
  0x39   : > { %360 = vst [vmem:[#allocation2 + $0x28] sm:$0xf] %v356_v16 }
  0x3e   : > { %v362_v17 = vld.sshfl [vmem:[#allocation1] sm:$0xff pattern:$0x75316420]  ;;  %v363_v18 = vld.sshfl [vmem:[#allocation1 + $0x8] sm:$0xff pattern:$0x75316420] }
  0x3f   : > { %390 = vst [vmem:[#allocation1] ss:$2 sm:$0xff] %v236_v0  ;;  %366 = vrot.lane.b32.xlu2 %v362_v17, %s696_s29  ;;  %v252_v17 = vld [vmem:[%s818_s2] ss:$8 sm:$0x3] }
  0x46   : > { %v391_v19 = vld.sshfl [vmem:[#allocation1] sm:$0xff pattern:$0x75316420]  ;;  %v392_v20 = vld.sshfl [vmem:[#allocation1 + $0x8] sm:$0xff pattern:$0x75316420] }
  0x47   : > { %395 = vrot.lane.b32.xlu0 %v391_v19, %s697_s30  ;;  %397 = vrot.lane.b32.xlu1 %v392_v20, %s697_s30  ;;  %413 = vst [vmem:[#allocation1] ss:$2 sm:$0xff] %v236_v0 }
  0x48   : > { %368 = vrot.lane.b32.xlu2 %v363_v18, %s696_s29  ;;  %v660_v18 = vld [vmem:[%s818_s2 + $0x10] ss:$8 sm:$0x3] }
  0x4e   : > { %v414_v21 = vld.sshfl [vmem:[#allocation1] sm:$0xff pattern:$0x75316420]  ;;  %v415_v22 = vld.sshfl [vmem:[#allocation1 + $0x8] sm:$0xff pattern:$0x75316420] }
  0x4f   : > { %418 = vrot.lane.b32.xlu0 %v414_v21, %s698_s6  ;;  %442 = vst [vmem:[#allocation1] ss:$2 sm:$0xff] %v236_v0 }
  0x50   : > { %243 = vrot.lane.b32.xlu2 %v239_v1, %s699_s7 }
  0x56   : > { %v443_v23 = vld.sshfl [vmem:[#allocation1] sm:$0xff pattern:$0x75316420]  ;;  %v444_v24 = vld.sshfl [vmem:[#allocation1 + $0x8] sm:$0xff pattern:$0x75316420] }
  0x57   : > { %420 = vrot.lane.b32.xlu0 %v415_v22, %s698_s6  ;;  %447 = vrot.lane.b32.xlu1 %v443_v23, %s700_s8  ;;  %478 = vst [vmem:[#allocation1] ss:$2 sm:$0xff] %v476_v12  ;;  %v254_v22 = vperm.slane %v252_v17, 0  ;;  %v255_v23 = vperm.slane %v252_v17, 1 }
  0x5f   : > { %245 = vrot.lane.b32.xlu0 %v240_v2, %s699_s7  ;;  %449 = vrot.lane.b32.xlu1 %v444_v24, %s700_s8  ;;  %v457_v24 = vperm.slane %v660_v18, 0 }
  0x67   : > { %298 = vrot.lane.b32.xlu1 %v293_v10, %s694_s27 }
  0x79   : > { %v270_v25 = vpop.permute.xlu2 %269 }
  0x89   : > { %v320_v31 = vpop.permute.xlu2 %319 }
  0x91   : > { %v268_v32 = vpop.permute.xlu1 %267 }
  0x92   : > { %v272_v33 = vsel %vm271_vm1, %v268_v32, %v270_v25  ;;  %v273_v34 = vsel %vm271_vm1, %v270_v25, %v268_v32  ;;  %v458_v25 = vperm.slane %v660_v18, 1 }
  0x93   : > { %v281_v35 = vmul.f32 %v277_v29, %v273_v34  ;;  %v282_v36 = vmul.f32 %v278_v30, %v272_v33 }
  0x95   : > { %v285_v37 = vrot.slane %v281_v35, 4  ;;  %v286_v38 = vrot.slane %v282_v36, 4 }
  0x97   : > { %289 = vst [vmem:[#allocation2 + $0x30] sm:$0xf0] %v285_v37  ;;  %v654_v37 = vld [vmem:[%s818_s2 + $0x2] ss:$8 sm:$0x3] }
  0x98   : > { %290 = vst [vmem:[#allocation2] sm:$0xf0] %v286_v38  ;;  %v306_v38 = vperm.slane %v654_v37, 0 }
  0x99   : > { %v759_v39 = vpop.permute.xlu0 %296  ;;  %v367_v40 = vpop.permute.xlu2 %366 }
  0xa1   : > { %v322_v44 = vpop.permute.xlu0 %321 }
  0xa2   : > { %v324_v46 = vsel %vm323_vm2, %v320_v31, %v322_v44  ;;  %v325_v47 = vsel %vm323_vm2, %v322_v44, %v320_v31  ;;  %v369_v50 = vpop.permute.xlu2 %368 }
  0xa3   : > { %v333_v51 = vmul.f32 %v329_v42, %v325_v47  ;;  %v334_v52 = vmul.f32 %v330_v43, %v324_v46  ;;  %v371_v53 = vsel %vm370_vm3, %v367_v40, %v369_v50  ;;  %v372_v54 = vsel %vm370_vm3, %v369_v50, %v367_v40 }
  0xa4   : > { %v380_v55 = vmul.f32 %v376_v48, %v371_v53  ;;  %v381_v56 = vmul.f32 %v377_v49, %v372_v54  ;;  %v307_v40 = vperm.slane %v654_v37, 1 }
  0xa5   : > { %v337_v57 = vrot.slane %v333_v51, 4  ;;  %v338_v58 = vrot.slane %v334_v52, 4  ;;  %v465_v52 = vld [vmem:[%s817_s1] sm:$0xf] }
  0xa6   : > { %v384_v59 = vrot.slane %v380_v55, 4  ;;  %v385_v60 = vrot.slane %v381_v56, 4  ;;  %v479_v55 = vld.sshfl [vmem:[#allocation1] sm:$0xff pattern:$0x75316420] }
  0xa7   : > { %341 = vst [vmem:[#allocation2 + $0x18] sm:$0xf0] %v337_v57  ;;  %v480_v56 = vld.sshfl [vmem:[#allocation1 + $0x8] sm:$0xff pattern:$0x75316420] }
  0xa8   : > { %342 = vst [vmem:[#allocation2 + $0x10] sm:$0xf0] %v338_v58 }
  0xa9   : > { %388 = vst [vmem:[#allocation2 + $0x48] sm:$0xf0] %v384_v59 }
  0xaa   : > { %389 = vst [vmem:[#allocation2 + $0x28] sm:$0xf0] %v385_v60  ;;  %v244_v21 = vpop.permute.xlu2 %243 }
  0xb0   : > { %v470_v49 = vld [vmem:[#allocation2 + $0x48] sm:$0xff] }
  0xb1   : > { %v471_v50 = vld [vmem:[#allocation2 + $0x28] sm:$0xff] }
  0xb9   : > { %v396_v0 = vpop.permute.xlu0 %395  ;;  %v398_v1 = vpop.permute.xlu1 %397 }
  0xba   : > { %v400_v2 = vsel %vm399_vm4, %v396_v0, %v398_v1  ;;  %v401_v3 = vsel %vm399_vm4, %v398_v1, %v396_v0 }
  0xbb   : > { %v409_v4 = vmul.f32 %v405_v62, %v400_v2  ;;  %v410_v5 = vmul.f32 %v406_v63, %v401_v3 }
  0xbd   : > { %411 = vst [vmem:[#allocation2 + $0x8] sm:$0xf] %v409_v4 }
  0xbe   : > { %412 = vst [vmem:[#allocation2 + $0x20] sm:$0xf] %v410_v5 }
  0xc1   : > { %v419_v6 = vpop.permute.xlu0 %418 }
  0xc9   : > { %v421_v10 = vpop.permute.xlu0 %420  ;;  %v448_v11 = vpop.permute.xlu1 %447 }
  0xca   : > { %v423_v13 = vsel %vm422_vm5, %v419_v6, %v421_v10  ;;  %v424_v14 = vsel %vm422_vm5, %v421_v10, %v419_v6 }
  0xcb   : > { %v432_v15 = vmul.f32 %v428_v8, %v423_v13  ;;  %v433_v16 = vmul.f32 %v429_v9, %v424_v14 }
  0xcd   : > { %v436_v19 = vrot.slane %v432_v15, 4  ;;  %v437_v20 = vrot.slane %v433_v16, 4 }
  0xcf   : > { %440 = vst [vmem:[#allocation2 + $0x8] sm:$0xf0] %v436_v19 }
  0xd0   : > { %441 = vst [vmem:[#allocation2 + $0x20] sm:$0xf0] %v437_v20 }
  0xd1   : > { %v246_v26 = vpop.permute.xlu0 %245  ;;  %v450_v28 = vpop.permute.xlu1 %449 }
  0xd2   : > { %v250_v29 = vsel %vm249_vm6, %v244_v21, %v246_v26  ;;  %v251_v30 = vsel %vm249_vm6, %v246_v26, %v244_v21  ;;  %v452_v31 = vsel %vm451_vm7, %v448_v11, %v450_v28  ;;  %v453_v32 = vsel %vm451_vm7, %v450_v28, %v448_v11 }
  0xd3   : > { %v258_v33 = vmul.f32 %v254_v22, %v251_v30  ;;  %v259_v34 = vmul.f32 %v255_v23, %v250_v29  ;;  %v461_v35 = vmul.f32 %v457_v24, %v452_v31  ;;  %v462_v36 = vmul.f32 %v458_v25, %v453_v32 }
  0xd5   : > { %260 = vst [vmem:[#allocation2 + $0x30] sm:$0xf] %v258_v33 }
  0xd6   : > { %261 = vst [vmem:[#allocation2] sm:$0xf] %v259_v34  ;;  %v472_v48 = vld [vmem:[#allocation2 + $0x8] sm:$0xff] }
  0xd7   : > { %463 = vst [vmem:[#allocation2 + $0x40] sm:$0xf] %v461_v35  ;;  %v473_v27 = vld [vmem:[#allocation2 + $0x20] sm:$0xff] }
  0xd8   : > { %464 = vst [vmem:[#allocation2 + $0x38] sm:$0xf] %v462_v36 }
  0xd9   : > { %v299_v41 = vpop.permute.xlu1 %298 }
  0xda   : > { %v301_v42 = vsel %vm300_vm8, %v759_v39, %v299_v41  ;;  %v302_v43 = vsel %vm300_vm8, %v299_v41, %v759_v39 }
  0xdb   : > { %v310_v44 = vmul.f32 %v306_v38, %v302_v43  ;;  %v311_v45 = vmul.f32 %v307_v40, %v301_v42 }
  0xdc   : > { %v466_v53 = vld [vmem:[#allocation2 + $0x30] sm:$0xff] }
  0xdd   : > { %312 = vst [vmem:[#allocation2 + $0x18] sm:$0xf] %v310_v44  ;;  %v467_v54 = vld [vmem:[#allocation2] sm:$0xff] }
  0xde   : > { %313 = vst [vmem:[#allocation2 + $0x10] sm:$0xf] %v311_v45  ;;  %v474_v46 = vld [vmem:[#allocation2 + $0x40] sm:$0xf] }
  0xdf   : > { %661 = vmatpush.msk.msra.mxu0 %vm349_vm0, %v474_v46  ;;  %v475_v47 = vld [vmem:[#allocation2 + $0x38] sm:$0xf] }
  0xe0   : > { %663 = vmatpush.msk.msra.mxu1 %vm349_vm0, %v475_v47 }
  0xe1   : > { %505 = vmatpush.msra.mxu0 %v472_v48 }
  0xe2   : > { %525 = vmatpush.msra.mxu1 %v473_v27 }
  0xe3   : > { %506 = vmatpush.msra.mxu0 %v470_v49 }
  0xe4   : > { %526 = vmatpush.msra.mxu1 %v471_v50  ;;  %v468_v51 = vld [vmem:[#allocation2 + $0x18] sm:$0xff] }
  0xe5   : > { %507 = vmatpush.msra.mxu0 %v468_v51  ;;  %v469_v39 = vld [vmem:[#allocation2 + $0x10] sm:$0xff] }
  0xe6   : > { %527 = vmatpush.msra.mxu1 %v469_v39 }
  0xe7   : > { %508 = vmatpush.msra.mxu0 %v466_v53 }
  0xe8   : > { %528 = vmatpush.msra.mxu1 %v467_v54  ;;  %662 = vmatmul.msk.f32.vlgmr.msra.gmra.mxu0 %vm483_vm9, %v465_v52 }
  0xe9   : > { %664 = vmatmul.msk.f32.vlgmr.msra.gmra.mxu1 %vm483_vm9, %v465_v52 }
 0x165   : > { %v510_v57 = vpop.f32.mrf.mxu0 }
 0x166   : > { %v511_v58 = vadd.f32 %v510_v57, %v479_v55  ;;  %v530_v59 = vpop.f32.mrf.mxu1 }
 0x167   : > { %v531_v60 = vadd.f32 %v530_v59, %v480_v56 }
 0x168   : > { %v533_v61 = vmax.f32 %v511_v58, 0.0 }
 0x169   : > { %v534_v62 = vmax.f32 %v531_v60, 0.0 }
 0x16a   : > { %v541_v63 = vsel %vm349_vm0, %v533_v61, 0.0  ;;  %v548_v0 = vmul.f32 %v533_v61, %v533_v61 }
 0x16b   : > { %v537_v1 = vrot.slane %v534_v62, 4  ;;  %v542_v2 = vsel %vm349_vm0, %v534_v62, 0.0  ;;  %v549_v3 = vmul.f32 %v534_v62, %v534_v62 }
 0x16c   : > { %v543_v4 = vadd.f32 %v542_v2, %v541_v63  ;;  %v550_v5 = vsel %vm349_vm0, %v548_v0, 0.0 }
 0x16d   : > { %v538_v6 = vsel %vm349_vm0, %v533_v61, %v537_v1  ;;  %v551_v7 = vsel %vm349_vm0, %v549_v3, 0.0 }
 0x16e   : > { %540 = vst [vmem:[%s231_s9] sm:$0xff] %v538_v6  ;;  %544 = vadd.xlane.f32.xlu1 %v543_v4  ;;  %v552_v8 = vadd.f32 %v551_v7, %v550_v5 }
 0x170   : > { %553 = vadd.xlane.f32.xlu2 %v552_v8 }
 0x1e1   : > { %v545_v9 = vpop.xlane.xlu1 %544 }
 0x1e2   : > { %547 = vst.msk [vmem:[%s235_s20] sm:$0xf] %vm546_vm10, %v545_v9 }
 0x1e3   : > { %v554_v10 = vpop.xlane.xlu2 %553 }
 0x1e4   : > { %556 = vst.msk [vmem:[%s235_s20] sm:$0xf] %vm555_vm11, %v554_v10 }
 0x1e5 PF: > { %s16_s18 = sadd.s32 1, %s691_s18  }
 0x1e6   : > { %p13_p4 = scmp.ge.s32.totalorder %s16_s18, 4  }
 0x1e8   :  { %15 = sbr.rel (!%p13_p4) target bundleno = 1 (0x1), region = 86 }

</bundles_post_ra>
